<compile_context>
chip_gen: v6e
topology: v6e:2x2x1
jax: 0.10.0
libtpu: 0.0.40
codegen_flags: <defaults>
</compile_context>

<pallas_src>
import math
import functools

import jax
import jax.numpy as jnp
from jax import lax
from jax.experimental import pallas as pl
from jax.experimental.pallas import tpu as pltpu


# -----------------------------------------------------------------------------
# Helpers
# -----------------------------------------------------------------------------
def _round_up(x, m):
    return (x + m - 1) // m * m


def _sinusoid_pe(rows, dim):
    """PE table identical to onmt PositionalEncoding (rows x dim, f32)."""
    pos = jnp.arange(rows, dtype=jnp.float32)[:, None]                  # [rows,1]
    div = jnp.exp(jnp.arange(0, dim, 2, dtype=jnp.float32)
                  * -(math.log(10000.0) / dim))                         # [dim/2]
    pe = jnp.zeros((rows, dim), dtype=jnp.float32)
    pe = pe.at[:, 0::2].set(jnp.sin(pos * div))
    pe = pe.at[:, 1::2].set(jnp.cos(pos * div))
    return pe


def _onehot_gather(idx_col, table):
    """Exact vectorized row gather via one-hot matmul on the MXU.

    idx_col: int32 (tm, 1); table: (W, D) float. Returns f32 (tm, D).
    """
    tm = idx_col.shape[0]
    w = table.shape[0]
    cols = lax.broadcasted_iota(jnp.int32, (tm, w), 1)
    onehot = (idx_col == cols).astype(table.dtype)            # exact 0/1
    return jnp.dot(onehot, table,
                   preferred_element_type=jnp.float32,
                   precision=lax.Precision.HIGHEST)


# -----------------------------------------------------------------------------
# Kernels (one grid step = one (tm, D) tile of the flattened output)
# -----------------------------------------------------------------------------
def _embed_kernel_plain(ids_ref, table_ref, o_ref):
    # ids_ref: i32[tm,1]  table_ref: f32[V,D]  o_ref: f32[tm,D]
    o_ref[...] = _onehot_gather(ids_ref[...], table_ref[...]).astype(o_ref.dtype)


def _embed_kernel_pe_step(ids_ref, table_ref, pe_ref, o_ref, *, scale):
    # pe_ref: f32[1,D] — single PE row (decode step), broadcast over the tile.
    rows = _onehot_gather(ids_ref[...], table_ref[...])
    o_ref[...] = (rows * scale + pe_ref[...]).astype(o_ref.dtype)


def _embed_kernel_pe_seq(ids_ref, pos_ref, table_ref, pe_ref, o_ref, *, scale):
    # pos_ref: i32[tm,1] position index per token; pe_ref: f32[L_pad,D].
    rows = _onehot_gather(ids_ref[...], table_ref[...])
    pe = _onehot_gather(pos_ref[...], pe_ref[...])
    o_ref[...] = (rows * scale + pe).astype(o_ref.dtype)


# -----------------------------------------------------------------------------
# Wrapper
# -----------------------------------------------------------------------------
def embeddings_forward(source, emb_table, *, position_encoding=True, step=None,
                       max_len=5000, tm=512):
    """source: int[len, batch, 1]; emb_table: f32[V, D] -> f32[len, batch, D]."""
    L, B, nfeat = source.shape
    assert nfeat == 1, "single (word) feature; concat of one feature == identity"
    V, D = emb_table.shape
    N = L * B

    # Large lane/sublane-dense token tiles; pad N up to a tile multiple.
    tm_eff = min(tm, _round_up(N, 8))
    n_pad = _round_up(N, tm_eff)
    grid = (n_pad // tm_eff,)

    ids = source[:, :, 0].astype(jnp.int32).reshape(N)
    ids = jnp.clip(ids, 0, V - 1)                     # guard against OOB token ids
    if n_pad != N:
        ids = jnp.pad(ids, (0, n_pad - N))            # pad with a valid id (0)
    ids = ids.reshape(n_pad, 1)

    ids_spec = pl.BlockSpec((tm_eff, 1), lambda i: (i, 0))
    table_spec = pl.BlockSpec((V, D), lambda i: (0, 0))        # grid-invariant
    out_spec = pl.BlockSpec((tm_eff, D), lambda i: (i, 0))

    if position_encoding:
        scale = math.sqrt(D)
        if step is None:
            l_pad = _round_up(max(L, 1), 8)
            pe_rows = _sinusoid_pe(l_pad, D)                        # tiny [L_pad, D]
            pos = jnp.arange(n_pad, dtype=jnp.int32) // B           # token -> position
            pos = jnp.clip(pos, 0, l_pad - 1).reshape(n_pad, 1)
            kernel = functools.partial(_embed_kernel_pe_seq, scale=scale)
            in_specs = [ids_spec,
                        pl.BlockSpec((tm_eff, 1), lambda i: (i, 0)),
                        table_spec,
                        pl.BlockSpec((l_pad, D), lambda i: (0, 0))]
            args = (ids, pos, emb_table, pe_rows)
        else:
            pe_row = _sinusoid_pe(int(step) + 1, D)[int(step)].reshape(1, D)
            kernel = functools.partial(_embed_kernel_pe_step, scale=scale)
            in_specs = [ids_spec, table_spec,
                        pl.BlockSpec((1, D), lambda i: (0, 0))]
            args = (ids, emb_table, pe_row)
    else:
        kernel = _embed_kernel_plain
        in_specs = [ids_spec, table_spec]
        args = (ids, emb_table)

    out_flat = pl.pallas_call(
        kernel,
        out_shape=jax.ShapeDtypeStruct((n_pad, D), emb_table.dtype),
        grid_spec=pltpu.PrefetchScalarGridSpec(
            num_scalar_prefetch=0,
            grid=grid,
            in_specs=in_specs,
            out_specs=out_spec,
        ),
        compiler_params=pltpu.CompilerParams(
            dimension_semantics=("parallel",),        # disjoint tiles -> megacore OK
            vmem_limit_bytes=64 * 1024 * 1024),
    )(*args)

    # TODO(synk): dropout is identity here (p=0 / eval mode), so it is omitted.
    return out_flat[:N].reshape(L, B, D)


# -----------------------------------------------------------------------------
# Pure-JAX reference (silent sanity check)
# -----------------------------------------------------------------------------
def embeddings_reference(source, emb_table, *, position_encoding=True, step=None,
                         max_len=5000):
    L, B, _ = source.shape
    V, D = emb_table.shape
    emb = emb_table[source[:, :, 0]]                                    # [L, B, D]
    if position_encoding:
        pe = _sinusoid_pe(max_len, D)
        emb = emb * math.sqrt(D)
        if step is None:
            emb = emb + pe[:L][:, None, :]
        else:
            emb = emb + pe[step][None, None, :]
    return emb


if __name__ == "__main__":
    # Module hyper-params (small, deterministic)
    word_vec_size = 128
    word_vocab_size = 64
    word_padding_idx = 1
    seq_len, batch = 8, 2

    key = jax.random.PRNGKey(0)
    k_emb, k_src = jax.random.split(key)

    # nn.Embedding default init: N(0, 1); padding row zeroed (padding_idx).
    emb_table = jax.random.normal(k_emb, (word_vocab_size, word_vec_size),
                                  dtype=jnp.float32)
    emb_table = emb_table.at[word_padding_idx].set(0.0)

    # source: [len, batch, nfeat=1] int32 token indices
    source = jax.random.randint(k_src, (seq_len, batch, 1), 0, word_vocab_size,
                                dtype=jnp.int32)

    # 1) positional encoding over the full sequence
    out = jax.block_until_ready(
        embeddings_forward(source, emb_table, position_encoding=True, step=None))
    ref = embeddings_reference(source, emb_table, position_encoding=True, step=None)
    assert out.shape == (seq_len, batch, word_vec_size)
    assert jnp.allclose(out, ref, atol=1e-4, rtol=1e-5)

    # 2) single decode step (pe[step] broadcast)
    out_s = jax.block_until_ready(
        embeddings_forward(source, emb_table, position_encoding=True, step=3))
    ref_s = embeddings_reference(source, emb_table, position_encoding=True, step=3)
    assert jnp.allclose(out_s, ref_s, atol=1e-4, rtol=1e-5)

    # 3) no positional encoding (pure lookup)
    out_n = jax.block_until_ready(
        embeddings_forward(source, emb_table, position_encoding=False))
    ref_n = embeddings_reference(source, emb_table, position_encoding=False)
    assert jnp.allclose(out_n, ref_n, atol=1e-4, rtol=1e-5)

    print("KERNEL_OK")
</pallas_src>

<mosaic_0001>
module attributes {stable_mosaic.version = 11 : i64} {
  func.func @_embed_kernel_pe_seq(%arg0: i32, %arg1: memref<16x1xi32, #tpu.memory_space<vmem>>, %arg2: memref<16x1xi32, #tpu.memory_space<vmem>>, %arg3: memref<64x128xf32, #tpu.memory_space<vmem>>, %arg4: memref<8x128xf32, #tpu.memory_space<vmem>>, %arg5: memref<16x128xf32, #tpu.memory_space<vmem>>) attributes {dimension_semantics = [#tpu.dimension_semantics<parallel>], iteration_bounds = array<i64: 1>, scalar_prefetch = 0 : i64, scratch_operands = 0 : i64, tpu.core_type = #tpu.core_type<tc>, window_params = [{transform_indices = @transform_0, window_bounds = array<i64: 16, 1>}, {transform_indices = @transform_1, window_bounds = array<i64: 16, 1>}, {pipeline_mode = #tpu.pipeline_mode<synchronous>, transform_indices = @transform_2, window_bounds = array<i64: 64, 128>}, {pipeline_mode = #tpu.pipeline_mode<synchronous>, transform_indices = @transform_3, window_bounds = array<i64: 8, 128>}, {transform_indices = @transform_4, window_bounds = array<i64: 16, 128>}]} {
    %c0 = arith.constant 0 : index
    %c0_0 = arith.constant 0 : index
    %0 = vector.load %arg1[%c0, %c0_0] : memref<16x1xi32, #tpu.memory_space<vmem>>, vector<16x1xi32>
    %c0_1 = arith.constant 0 : index
    %c0_2 = arith.constant 0 : index
    %1 = vector.load %arg3[%c0_1, %c0_2] : memref<64x128xf32, #tpu.memory_space<vmem>>, vector<64x128xf32>
    %2 = tpu.iota {dimensions = array<i32: 1>} : vector<16x64xi32>
    %3 = vector.broadcast %0 : vector<16x1xi32> to vector<16x64xi32>
    %4 = arith.cmpi eq, %3, %2 : vector<16x64xi32>
    %5 = arith.extui %4 : vector<16x64xi1> to vector<16x64xi32>
    %6 = arith.sitofp %5 : vector<16x64xi32> to vector<16x64xf32>
    %cst = arith.constant dense<0.000000e+00> : vector<16x128xf32>
    %7 = tpu.matmul %6, %1, %cst {dimension_numbers = #tpu.dot_dimension_numbers<[1], [0], [0], [1], [0, 0, 1, 1], [], []>, precision = #tpu.contract_precision<fp32>} : vector<16x64xf32>, vector<64x128xf32>, vector<16x128xf32> -> vector<16x128xf32>
    %c0_3 = arith.constant 0 : index
    %c0_4 = arith.constant 0 : index
    %8 = vector.load %arg2[%c0_3, %c0_4] : memref<16x1xi32, #tpu.memory_space<vmem>>, vector<16x1xi32>
    %c0_5 = arith.constant 0 : index
    %c0_6 = arith.constant 0 : index
    %9 = vector.load %arg4[%c0_5, %c0_6] : memref<8x128xf32, #tpu.memory_space<vmem>>, vector<8x128xf32>
    %10 = tpu.iota {dimensions = array<i32: 1>} : vector<16x8xi32>
    %11 = vector.broadcast %8 : vector<16x1xi32> to vector<16x8xi32>
    %12 = arith.cmpi eq, %11, %10 : vector<16x8xi32>
    %13 = arith.extui %12 : vector<16x8xi1> to vector<16x8xi32>
    %14 = arith.sitofp %13 : vector<16x8xi32> to vector<16x8xf32>
    %cst_7 = arith.constant dense<0.000000e+00> : vector<16x128xf32>
    %15 = tpu.matmul %14, %9, %cst_7 {dimension_numbers = #tpu.dot_dimension_numbers<[1], [0], [0], [1], [0, 0, 1, 1], [], []>, precision = #tpu.contract_precision<fp32>} : vector<16x8xf32>, vector<8x128xf32>, vector<16x128xf32> -> vector<16x128xf32>
    %cst_8 = arith.constant 11.3137083 : f32
    %16 = vector.broadcast %cst_8 : f32 to vector<16x128xf32>
    %17 = arith.mulf %7, %16 : vector<16x128xf32>
    %18 = arith.addf %17, %15 : vector<16x128xf32>
    %c0_9 = arith.constant 0 : index
    %c0_10 = arith.constant 0 : index
    %19 = vector.load %arg5[%c0_9, %c0_10] : memref<16x128xf32, #tpu.memory_space<vmem>>, vector<16x128xf32>
    tpu.vector_store %arg5[%c0_9, %c0_10], %18 {strides = array<i32>} : memref<16x128xf32, #tpu.memory_space<vmem>>, vector<16x128xf32>,
    return
  }
  func.func @transform_0(%arg0: i32) -> (i32, i32) {
    %c0_i32 = arith.constant 0 : i32
    %c0_i32_0 = arith.constant 0 : i32
    return %arg0, %c0_i32 : i32, i32
  }
  func.func @transform_1(%arg0: i32) -> (i32, i32) {
    %c0_i32 = arith.constant 0 : i32
    %c0_i32_0 = arith.constant 0 : i32
    return %arg0, %c0_i32 : i32, i32
  }
  func.func @transform_2(%arg0: i32) -> (i32, i32) {
    %c0_i32 = arith.constant 0 : i32
    %c0_i32_0 = arith.constant 0 : i32
    %c0_i32_1 = arith.constant 0 : i32
    return %c0_i32, %c0_i32_0 : i32, i32
  }
  func.func @transform_3(%arg0: i32) -> (i32, i32) {
    %c0_i32 = arith.constant 0 : i32
    %c0_i32_0 = arith.constant 0 : i32
    %c0_i32_1 = arith.constant 0 : i32
    return %c0_i32, %c0_i32_0 : i32, i32
  }
  func.func @transform_4(%arg0: i32) -> (i32, i32) {
    %c0_i32 = arith.constant 0 : i32
    %c0_i32_0 = arith.constant 0 : i32
    return %arg0, %c0_i32 : i32, i32
  }
}

</mosaic_0001>

<bundles_post_ra>
// kernel: tpu_custom_call.1
= control target key start
LH: loop header
LB: loop body
LE: loop exit
PB: predicated region body
PF: predicated region fallthrough
CT: control target
= control target key end

     0   :  { %9 = vsyncpa [#allocation3], 0  ;;  %s1744_s0 = inlined_call_operand.vmem [shape: s32[16,1], index: 0, kind: input, shape index: {}]   ;;  %s1745_s1 = inlined_call_operand.vmem [shape: s32[16,1], index: 1, kind: input, shape index: {}]   ;;  %s1746_s2 = inlined_call_operand.hbm [shape: f32[64,128], index: 2, kind: input, shape index: {}]   ;;  %s1747_s3 = inlined_call_operand.vmem [shape: f32[8,128], index: 3, kind: input, shape index: {}]   ;;  %s1748_s4 = inlined_call_operand.hbm [shape: f32[16,128], index: 4, kind: output, shape index: {}]  }
   0x1   :  { %10 = vsyncpa [#allocation4], 0  ;;  %s1467_s15 = smov [#allocation2]  }
   0x2   :  { %s20_s16 = sshll.u32 %s1467_s15, 4  ;;  %s21_s16 = int_to_ptr.vmem [resolvable:$true] %s20_s16 }
   0x3   :  { %s1431_s17 = scalar_lea.vmem %s21_s16, 1024  ;;  %p1436_p1 = scmp.lt.s32.totalorder %s21_s16, %s21_s16 }
   0x4   :  { %p1432_p0 = scmp.ne.s32.totalorder %s21_s16, %s1431_s17  ;;  %p1437_p2 = scmp.lt.s32.totalorder %s1431_s17, %s1431_s17 }
   0x6   :  { %p1438_p3 = por %p1437_p2, %p1436_p1 }
   0x8   :  { %p1439_p4 = pnand %p1438_p3, %p1432_p0 }
   0xa   :  { %1442 = shalt.err (!%p1439_p4)
}
   0xb   :  { %s1468_s18 = smov 128   ;;  %s1469_s19 = smov 8  }
   0xc   :  { %26 = dma.hbm_to_vmem [thread:$0]  %s1746_s2, 1024, %s21_s16, [#allocation3], %s1468_s18, %s1468_s18, %s1469_s19  }
   0xd   :  { %1463 = dma.done.wait [#allocation3], 1024  }
   0xe   :  { %1464 = vsyncadd [#allocation3], 4294966272  ;;  %v1470_v0 = vmov 0   ;;  %v32_v1 = vld [vmem:[%s1744_s0] sm:$0xff]  ;;  %v33_v2 = vld [vmem:[%s1744_s0 + $0x8] sm:$0xff]  ;;  %v42_v53 = vlaneseq  ;;  %vm56_vm0 = vcmask 523264  }
   0xf   :  { %1421 = vset.pattern.permute.xlu0 %v1470_v0  ;;  %1422 = vset.pattern.permute.xlu1 %v1470_v0  ;;  %v643_v3 = vld [vmem:[%s1745_s1] sm:$0xff]  ;;  %v644_v4 = vld [vmem:[%s1745_s1 + $0x8] sm:$0xff]  ;;  %v41_v5 = vld [vmem:[#allocation2 + $0x38] sm:$0xff]  ;;  %v1471_v56 = vmov 0.0   ;;  %vm658_vm5 = vcmask 64512  }
  0x10   :  { %45 = vperm.xlu0 %1421, %v32_v1   ;;  %647 = vperm.xlu1 %1422, %v643_v3   ;;  %v40_v6 = vld [vmem:[#allocation2 + $0x30] sm:$0xff]  ;;  %v1516_v7 = vand.u32 4294901760, %v41_v5  ;;  %v39_v9 = vld [vmem:[#allocation2 + $0x28] sm:$0xff]  ;;  %v38_v10 = vld [vmem:[#allocation2 + $0x20] sm:$0xff]  ;;  %v1614_v54 = vand.u32 127, %v42_v53 }
  0x11   :  { %v1518_v8 = vand.u32 4294901760, %v40_v6  ;;  %v37_v11 = vld [vmem:[#allocation2 + $0x18] sm:$0xff]  ;;  %v1520_v12 = vand.u32 4294901760, %v39_v9  ;;  %v1522_v13 = vand.u32 4294901760, %v38_v10  ;;  %v36_v15 = vld [vmem:[#allocation2 + $0x10] sm:$0xff]  ;;  %v35_v16 = vld [vmem:[#allocation2 + $0x8] sm:$0xff] }
  0x12   :  { %v1524_v14 = vand.u32 4294901760, %v37_v11  ;;  %v34_v17 = vld [vmem:[#allocation2] sm:$0xff]  ;;  %v1527_v18 = vsub.f32 %v41_v5, %v1516_v7  ;;  %1271 = vmatprep.subr.mxu0 %v1516_v7  ;;  %v1533_v20 = vand.u32 4294901760, %v36_v15  ;;  %v1535_v21 = vand.u32 4294901760, %v35_v16 }
  0x13   :  { %v1530_v19 = vsub.f32 %v40_v6, %v1518_v8  ;;  %v1538_v22 = vsub.f32 %v39_v9, %v1520_v12  ;;  %v1541_v23 = vsub.f32 %v38_v10, %v1522_v13  ;;  %v1546_v25 = vand.u32 4294901760, %v34_v17  ;;  %1272 = vmatpush3.msra.mxu0 %v1516_v7  ;;  %v645_v6 = vld [vmem:[%s1747_s3] sm:$0xff]  ;;  %s1472_s3 = smov [#allocation5]  }
  0x14   :  { %48 = vperm.xlu0 %1421, %v33_v2   ;;  %650 = vperm.xlu1 %1422, %v644_v4   ;;  %v1544_v24 = vsub.f32 %v37_v11, %v1524_v14  ;;  %v1549_v26 = vand.u32 4294901760, %v1527_v18  ;;  %v1556_v28 = vsub.f32 %v36_v15, %v1533_v20  ;;  %v1574_v34 = vsub.f32 %v35_v16, %v1535_v21  ;;  %s1165_s29 = sshll.u32 %s1472_s3, 4  ;;  %s1166_s29 = int_to_ptr.vmem [resolvable:$true] %s1165_s29 }
  0x15   :  { %v1552_v27 = vand.u32 4294901760, %v1530_v19  ;;  %v1559_v29 = vand.u32 4294901760, %v1538_v22  ;;  %v1562_v30 = vand.u32 4294901760, %v1541_v23  ;;  %1273 = vmatprep.subr.mxu0 %v1518_v8  ;;  %v1580_v36 = vsub.f32 %v34_v17, %v1546_v25  ;;  %s1443_s30 = scalar_lea.vmem %s1166_s29, 256  ;;  %p1448_p6 = scmp.lt.s32.totalorder %s1166_s29, %s1166_s29 }
  0x16   :  { %v176_v31 = vsub.f32 %v1527_v18, %v1549_v26  ;;  %v1570_v33 = vand.u32 4294901760, %v1544_v24  ;;  %1274 = vmatpush3.msra.mxu0 %v1518_v8  ;;  %v1585_v40 = vand.u32 4294901760, %v1556_v28  ;;  %v1592_v43 = vand.u32 4294901760, %v1574_v34  ;;  %p1444_p5 = scmp.ne.s32.totalorder %s1166_s29, %s1443_s30  ;;  %p1449_p7 = scmp.lt.s32.totalorder %s1443_s30, %s1443_s30 }
  0x17   :  { %v183_v32 = vsub.f32 %v1530_v19, %v1552_v27  ;;  %v190_v35 = vsub.f32 %v1538_v22, %v1559_v29  ;;  %1275 = vmatprep.subr.mxu0 %v1520_v12  ;;  %v197_v39 = vsub.f32 %v1541_v23, %v1562_v30  ;;  %v1599_v46 = vand.u32 4294901760, %v1580_v36 }
  0x18   :  { %v177_v37 = vand.u32 4294901760, %v176_v31  ;;  %1276 = vmatpush3.msra.mxu0 %v1520_v12  ;;  %v204_v42 = vsub.f32 %v1544_v24, %v1570_v33  ;;  %v211_v45 = vsub.f32 %v1556_v28, %v1585_v40  ;;  %v218_v48 = vsub.f32 %v1574_v34, %v1592_v43  ;;  %p1450_p8 = por %p1449_p7, %p1448_p6 }
  0x19   :  { %v184_v38 = vand.u32 4294901760, %v183_v32  ;;  %1277 = vmatprep.subr.mxu0 %v1522_v13  ;;  %v191_v41 = vand.u32 4294901760, %v190_v35  ;;  %v198_v44 = vand.u32 4294901760, %v197_v39  ;;  %v225_v50 = vsub.f32 %v1580_v36, %v1599_v46 }
  0x1a   :  { %1290 = vmatprep.subr.mxu1 %v177_v37  ;;  %1278 = vmatpush3.msra.mxu0 %v1522_v13  ;;  %v205_v47 = vand.u32 4294901760, %v204_v42  ;;  %v212_v49 = vand.u32 4294901760, %v211_v45  ;;  %v219_v51 = vand.u32 4294901760, %v218_v48  ;;  %v1658_v10 = vand.u32 4294901760, %v645_v6  ;;  %p1451_p9 = pnand %p1450_p8, %p1444_p5 }
  0x1b   :  { %1291 = vmatpush3.msra.mxu1 %v177_v37  ;;  %1279 = vmatprep.subr.mxu0 %v1524_v14  ;;  %v226_v52 = vand.u32 4294901760, %v225_v50 }
  0x1c   :  { %1292 = vmatprep.subr.mxu1 %v184_v38  ;;  %1280 = vmatpush3.msra.mxu0 %v1524_v14  ;;  %v1670_v15 = vsub.f32 %v645_v6, %v1658_v10 }
  0x1d   :  { %1293 = vmatpush3.msra.mxu1 %v184_v38  ;;  %1281 = vmatprep.subr.mxu0 %v1533_v20 }
  0x1e   :  { %1294 = vmatprep.subr.mxu1 %v191_v41  ;;  %1282 = vmatpush3.msra.mxu0 %v1533_v20 }
  0x1f   :  { %1295 = vmatpush3.msra.mxu1 %v191_v41  ;;  %1283 = vmatprep.subr.mxu0 %v1535_v21 }
  0x20   :  { %1296 = vmatprep.subr.mxu1 %v198_v44  ;;  %1284 = vmatpush3.msra.mxu0 %v1535_v21 }
  0x21   :  { %1297 = vmatpush3.msra.mxu1 %v198_v44  ;;  %1285 = vmatprep.subr.mxu0 %v1546_v25 }
  0x22   :  { %1298 = vmatprep.subr.mxu1 %v205_v47  ;;  %1286 = vmatpush3.msra.mxu0 %v1546_v25 }
  0x23   :  { %1299 = vmatpush3.msra.mxu1 %v205_v47  ;;  %1309 = vmatprep.subr.mxu0 %v1527_v18 }
  0x24   :  { %1300 = vmatprep.subr.mxu1 %v212_v49 }
  0x25   :  { %1301 = vmatpush3.msra.mxu1 %v212_v49 }
  0x26   :  { %1302 = vmatprep.subr.mxu1 %v219_v51 }
  0x27   :  { %1303 = vmatpush3.msra.mxu1 %v219_v51 }
  0x28   :  { %1304 = vmatprep.subr.mxu1 %v226_v52 }
  0x29   :  { %1305 = vmatpush3.msra.mxu1 %v226_v52 }
  0x2a   :  { %1328 = vmatprep.subr.mxu1 %v1516_v7 }
  0x8b   :  { %v46_v55 = vpop.permute.xlu0 %45  ;;  %v648_v9 = vpop.permute.xlu1 %647 }
  0x8c   :  { %vm50_vm1 = vcmp.eq.s32.totalorder %v46_v55, %v1614_v54  ;;  %vm652_vm3 = vcmp.eq.s32.totalorder %v648_v9, %v1614_v54 }
  0x8d   :  { %v1618_v57 = vsel %vm50_vm1, 1.0, %v1471_v56 }
  0x8e   :  { %v58_v58 = vsel %vm56_vm0, %v1618_v57, 0  ;;  %1306 = vmatprep.mubr.msk.f32.mxu1 %vm56_vm0, %v1618_v57 }
  0x8f   :  { %v137_v59 = vsub.f32 %v58_v58, %v58_v58  ;;  %v49_v60 = vpop.permute.xlu0 %48  ;;  %v651_v11 = vpop.permute.xlu1 %650 }
  0x90   :  { %vm51_vm2 = vcmp.eq.s32.totalorder %v49_v60, %v1614_v54  ;;  %vm653_vm4 = vcmp.eq.s32.totalorder %v651_v11, %v1614_v54 }
  0x91   :  { %v1626_v61 = vsel %vm51_vm2, 1.0, %v1471_v56  ;;  %v138_v62 = vand.u32 4294901760, %v137_v59 }
  0x92   :  { %v61_v63 = vsel %vm56_vm0, %v1626_v61, 0  ;;  %1307 = vmatmul.mubr.msk.f32.vlgmr.msra.gmra.mxu1 %vm56_vm0, %v1626_v61 }
  0x93   :  { %v147_v0 = vsub.f32 %v61_v63, %v61_v63  ;;  %1329 = vmatpush3.msra.mxu1 %v1516_v7  ;;  %1344 = vmatprep.mubr.f32.mxu1 %v138_v62  ;;  %v139_v1 = vsub.f32 %v137_v59, %v138_v62 }
  0x94   :  { %1330 = vmatprep.subr.mxu1 %v1518_v8 }
  0x95   :  { %1331 = vmatpush3.msra.mxu1 %v1518_v8  ;;  %v140_v2 = vand.u32 4294901760, %v139_v1  ;;  %v148_v3 = vand.u32 4294901760, %v147_v0 }
  0x96   :  { %1332 = vmatprep.subr.mxu1 %v1520_v12 }
  0x97   :  { %1333 = vmatpush3.msra.mxu1 %v1520_v12  ;;  %1287 = vmatprep.mubr.f32.mxu0 %v140_v2  ;;  %v149_v4 = vsub.f32 %v147_v0, %v148_v3 }
  0x98   :  { %1334 = vmatprep.subr.mxu1 %v1522_v13 }
  0x99   :  { %1335 = vmatpush3.msra.mxu1 %v1522_v13  ;;  %v150_v5 = vand.u32 4294901760, %v149_v4 }
  0x9a   :  { %1336 = vmatprep.subr.mxu1 %v1524_v14 }
  0x9b   :  { %1337 = vmatpush3.msra.mxu1 %v1524_v14  ;;  %1288 = vmatmul.mubr.f32.vlgmr.msra.gmra.mxu0 %v150_v5 }
  0x9c   :  { %1310 = vmatpush3.msra.mxu0 %v1527_v18  ;;  %1338 = vmatprep.subr.mxu1 %v1533_v20 }
  0x9d   :  { %1311 = vmatprep.subr.mxu0 %v1530_v19  ;;  %1325 = vmatprep.mubr.f32.mxu0 %v137_v59 }
  0x9e   :  { %1339 = vmatpush3.msra.mxu1 %v1533_v20  ;;  %1312 = vmatpush3.msra.mxu0 %v1530_v19 }
  0x9f   :  { %1340 = vmatprep.subr.mxu1 %v1535_v21  ;;  %1313 = vmatprep.subr.mxu0 %v1538_v22 }
  0xa0   :  { %1341 = vmatpush3.msra.mxu1 %v1535_v21  ;;  %1314 = vmatpush3.msra.mxu0 %v1538_v22 }
  0xa1   :  { %1342 = vmatprep.subr.mxu1 %v1546_v25  ;;  %1315 = vmatprep.subr.mxu0 %v1541_v23 }
  0xa2   :  { %1343 = vmatpush3.msra.mxu1 %v1546_v25  ;;  %1316 = vmatpush3.msra.mxu0 %v1541_v23 }
  0xa3   :  { %1345 = vmatmul.mubr.f32.vlgmr.msra.gmra.mxu1 %v148_v3  ;;  %1366 = vmatprep.subr.mxu1 %v1516_v7 }
  0xa4   :  { %1317 = vmatprep.subr.mxu0 %v1544_v24  ;;  %1367 = vmatpush3.msra.mxu1 %v1516_v7  ;;  %v1682_v7 = vsel %vm652_vm3, 1.0, %v1471_v56 }
  0xa5   :  { %1382 = vmatprep.mubr.msk.f32.mxu1 %vm56_vm0, %v1618_v57  ;;  %1318 = vmatpush3.msra.mxu0 %v1544_v24 }
  0xa6   :  { %1368 = vmatprep.subr.mxu1 %v1518_v8  ;;  %1319 = vmatprep.subr.mxu0 %v1556_v28 }
  0xa7   :  { %1369 = vmatpush3.msra.mxu1 %v1518_v8  ;;  %1320 = vmatpush3.msra.mxu0 %v1556_v28  ;;  %v784_v8 = vand.u32 4294901760, %v1670_v15 }
  0xa8   :  { %1370 = vmatprep.subr.mxu1 %v1520_v12  ;;  %1321 = vmatprep.subr.mxu0 %v1574_v34 }
  0xa9   :  { %1371 = vmatpush3.msra.mxu1 %v1520_v12  ;;  %1322 = vmatpush3.msra.mxu0 %v1574_v34  ;;  %v1186_v12 = vsel %vm653_vm4, 1.0, %v1471_v56  ;;  %v785_v16 = vsub.f32 %v1670_v15, %v784_v8 }
  0xaa   :  { %1372 = vmatprep.subr.mxu1 %v1522_v13  ;;  %1323 = vmatprep.subr.mxu0 %v1580_v36 }
  0xab   :  { %1373 = vmatpush3.msra.mxu1 %v1522_v13  ;;  %1324 = vmatpush3.msra.mxu0 %v1580_v36  ;;  %v660_v13 = vsel %vm658_vm5, %v1682_v7, 0  ;;  %v786_v19 = vand.u32 4294901760, %v785_v16 }
  0xac   :  { %1374 = vmatprep.subr.mxu1 %v1524_v14  ;;  %1326 = vmatmul.mubr.f32.vlgmr.msra.gmra.mxu0 %v147_v0  ;;  %v732_v17 = vsub.f32 %v660_v13, %v660_v13 }
  0xad   :  { %1347 = vmatprep.subr.mxu0 %v1549_v26  ;;  %1375 = vmatpush3.msra.mxu1 %v1524_v14  ;;  %v663_v14 = vsel %vm658_vm5, %v1186_v12, 0 }
  0xae   :  { %1348 = vmatpush3.msra.mxu0 %v1549_v26  ;;  %1363 = vmatprep.mubr.msk.f32.mxu0 %vm56_vm0, %v1618_v57  ;;  %v742_v18 = vsub.f32 %v663_v14, %v663_v14 }
  0xaf   :  { %1376 = vmatprep.subr.mxu1 %v1533_v20  ;;  %1349 = vmatprep.subr.mxu0 %v1552_v27 }
  0xb0   :  { %1377 = vmatpush3.msra.mxu1 %v1533_v20  ;;  %1350 = vmatpush3.msra.mxu0 %v1552_v27  ;;  %v733_v20 = vand.u32 4294901760, %v732_v17 }
  0xb1   :  { %1378 = vmatprep.subr.mxu1 %v1535_v21  ;;  %1351 = vmatprep.subr.mxu0 %v1559_v29 }
  0xb2   :  { %1379 = vmatpush3.msra.mxu1 %v1535_v21  ;;  %1352 = vmatpush3.msra.mxu0 %v1559_v29  ;;  %v743_v21 = vand.u32 4294901760, %v742_v18  ;;  %v734_v22 = vsub.f32 %v732_v17, %v733_v20 }
  0xb3   :  { %1380 = vmatprep.subr.mxu1 %v1546_v25  ;;  %1353 = vmatprep.subr.mxu0 %v1562_v30 }
  0xb4   :  { %1381 = vmatpush3.msra.mxu1 %v1546_v25  ;;  %1354 = vmatpush3.msra.mxu0 %v1562_v30  ;;  %v744_v23 = vsub.f32 %v742_v18, %v743_v21  ;;  %v735_v24 = vand.u32 4294901760, %v734_v22 }
  0xb5   :  { %1383 = vmatmul.mubr.msk.f32.vlgmr.msra.gmra.mxu1 %vm56_vm0, %v1626_v61  ;;  %1355 = vmatprep.subr.mxu0 %v1570_v33 }
  0xb6   :  { %1392 = vmatprep.mubr.msk.f32.mxu1 %vm658_vm5, %v1682_v7  ;;  %1356 = vmatpush3.msra.mxu0 %v1570_v33  ;;  %v745_v25 = vand.u32 4294901760, %v744_v23 }
  0xb7   :  { %1390 = vmatprep.subr.mxu1 %v786_v19  ;;  %1357 = vmatprep.subr.mxu0 %v1585_v40 }
  0xb8   :  { %1391 = vmatpush3.msra.mxu1 %v786_v19  ;;  %1358 = vmatpush3.msra.mxu0 %v1585_v40 }
  0xb9   :  { %1393 = vmatmul.mubr.msk.f32.vlgmr.msra.gmra.mxu1 %vm658_vm5, %v1186_v12  ;;  %1359 = vmatprep.subr.mxu0 %v1592_v43 }
  0xba   :  { %1360 = vmatpush3.msra.mxu0 %v1592_v43  ;;  %1400 = vmatprep.subr.mxu1 %v1658_v10 }
  0xbb   :  { %1402 = vmatprep.mubr.f32.mxu1 %v733_v20  ;;  %1361 = vmatprep.subr.mxu0 %v1599_v46 }
  0xbc   :  { %1401 = vmatpush3.msra.mxu1 %v1658_v10  ;;  %1362 = vmatpush3.msra.mxu0 %v1599_v46 }
  0xbd   :  { %1403 = vmatmul.mubr.f32.vlgmr.msra.gmra.mxu1 %v743_v21  ;;  %1364 = vmatmul.mubr.msk.f32.vlgmr.msra.gmra.mxu0 %vm56_vm0, %v1626_v61 }
  0xbe   :  { %1385 = vmatprep.subr.mxu0 %v1658_v10  ;;  %1412 = vmatprep.mubr.msk.f32.mxu1 %vm658_vm5, %v1682_v7 }
  0xbf   :  { %1386 = vmatpush3.msra.mxu0 %v1658_v10  ;;  %1387 = vmatprep.mubr.f32.mxu0 %v735_v24 }
  0xc0   :  { %1410 = vmatprep.subr.mxu1 %v1658_v10  ;;  %1395 = vmatprep.subr.mxu0 %v1670_v15 }
  0xc1   :  { %1411 = vmatpush3.msra.mxu1 %v1658_v10  ;;  %1388 = vmatmul.mubr.f32.vlgmr.msra.gmra.mxu0 %v745_v25 }
  0xc2   :  { %1413 = vmatmul.mubr.msk.f32.vlgmr.msra.gmra.mxu1 %vm658_vm5, %v1186_v12  ;;  %1396 = vmatpush3.msra.mxu0 %v1670_v15 }
  0xc3   :  { %1397 = vmatprep.mubr.f32.mxu0 %v732_v17  ;;  %1405 = vmatprep.subr.mxu0 %v784_v8 }
  0xc5   :  { %1398 = vmatmul.mubr.f32.vlgmr.msra.gmra.mxu0 %v742_v18 }
  0xc6   :  { %1406 = vmatpush3.msra.mxu0 %v784_v8  ;;  %1407 = vmatprep.mubr.msk.f32.mxu0 %vm658_vm5, %v1682_v7 }
  0xc9   :  { %1408 = vmatmul.mubr.msk.f32.vlgmr.msra.gmra.mxu0 %vm658_vm5, %v1186_v12 }
 0x152   :  { %v1308_v26 = vpop.f32.mrf.mxu1 }
 0x154   :  { %v263_v27 = vpop.f32.mrf.mxu1 }
 0x15b   :  { %v1289_v29 = vpop.f32.mrf.mxu0 }
 0x15c   :  { %v270_v37 = vadd.f32 %v1308_v26, %v1289_v29 }
 0x15d   :  { %v142_v31 = vpop.f32.mrf.mxu0 }
 0x15e   :  { %v264_v40 = vadd.f32 %v263_v27, %v142_v31 }
 0x163   :  { %v1346_v28 = vpop.f32.mrf.mxu1 }
 0x165   :  { %v445_v30 = vpop.f32.mrf.mxu1 }
 0x16c   :  { %v1327_v33 = vpop.f32.mrf.mxu0 }
 0x16d   :  { %v365_v41 = vadd.f32 %v1327_v33, %v270_v37 }
 0x16e   :  { %v357_v36 = vpop.f32.mrf.mxu0 }
 0x16f   :  { %v358_v43 = vadd.f32 %v357_v36, %v264_v40  ;;  %v454_v46 = vadd.f32 %v1346_v28, %v365_v41 }
 0x171   :  { %v446_v49 = vadd.f32 %v445_v30, %v358_v43 }
 0x175   :  { %v1384_v32 = vpop.f32.mrf.mxu1 }
 0x177   :  { %v633_v34 = vpop.f32.mrf.mxu1 }
 0x179   :  { %v1394_v35 = vpop.f32.mrf.mxu1 }
 0x17b   :  { %v823_v38 = vpop.f32.mrf.mxu1 }
 0x17d   :  { %v1365_v39 = vpop.f32.mrf.mxu0  ;;  %v1404_v44 = vpop.f32.mrf.mxu1 }
 0x17e   :  { %v555_v48 = vadd.f32 %v1365_v39, %v454_v46 }
 0x17f   :  { %v548_v42 = vpop.f32.mrf.mxu0  ;;  %v984_v51 = vpop.f32.mrf.mxu1 }
 0x180   :  { %v549_v53 = vadd.f32 %v548_v42, %v446_v49  ;;  %v640_v57 = vadd.f32 %v1384_v32, %v555_v48 }
 0x181   :  { %v1389_v45 = vpop.f32.mrf.mxu0 }
 0x182   :  { %v830_v50 = vadd.f32 %v1394_v35, %v1389_v45  ;;  %v1414_v60 = vpop.f32.mrf.mxu1  ;;  %v634_v62 = vadd.f32 %v633_v34, %v549_v53  ;;  %v1155_v2 = vmul.f32 11.313708, %v640_v57 }
 0x183   :  { %v737_v47 = vpop.f32.mrf.mxu0 }
 0x184   :  { %v824_v54 = vadd.f32 %v823_v38, %v737_v47  ;;  %v1144_v5 = vpop.f32.mrf.mxu1  ;;  %v1154_v6 = vmul.f32 11.313708, %v634_v62 }
 0x185   :  { %v1399_v52 = vpop.f32.mrf.mxu0 }
 0x186   :  { %v911_v55 = vadd.f32 %v1399_v52, %v830_v50 }
 0x187   :  { %v903_v56 = vpop.f32.mrf.mxu0 }
 0x188   :  { %v904_v58 = vadd.f32 %v903_v56, %v824_v54  ;;  %v993_v59 = vadd.f32 %v1404_v44, %v911_v55 }
 0x189   :  { %v1409_v61 = vpop.f32.mrf.mxu0 }
 0x18a   :  { %v1073_v63 = vadd.f32 %v1409_v61, %v993_v59  ;;  %v985_v0 = vadd.f32 %v984_v51, %v904_v58 }
 0x18b   :  { %v1066_v1 = vpop.f32.mrf.mxu0 }
 0x18c   :  { %v1151_v3 = vadd.f32 %v1414_v60, %v1073_v63  ;;  %v1067_v4 = vadd.f32 %v1066_v1, %v985_v0 }
 0x18e   :  { %v1157_v9 = vadd.f32 %v1155_v2, %v1151_v3  ;;  %v1145_v10 = vadd.f32 %v1144_v5, %v1067_v4 }
 0x190   :  { %1159 = vst [vmem:[#allocation5 + $0x8] sm:$0xff] %v1157_v9  ;;  %v1156_v11 = vadd.f32 %v1154_v6, %v1145_v10 }
 0x192   :  { %1158 = vst [vmem:[#allocation5] sm:$0xff] %v1156_v11 }
 0x193   :  { %1454 = shalt.err (!%p1451_p9)
}
 0x194   :  { %1171 = dma.vmem_to_hbm [thread:$0]  %s1166_s29, 256, %s1748_s4, [#allocation4], %s1468_s18, %s1468_s18, %s1469_s19  }
 0x195   :  { %1465 = dma.done.wait [#allocation4], 256  }
 0x196   :  { %1466 = vsyncadd [#allocation4], 4294967040 }
 0x197   :  { %1175 = vsyncpa [#allocation3], 1 }
 0x198   :  { %1176 = vsyncpa [#allocation4], 1 }

</bundles_post_ra>
